<compile_context>
chip_gen: v7x
topology: tpu7x:2x2x1
jax: 0.10.0
libtpu: 0.0.40
codegen_flags: <defaults>
</compile_context>

<pallas_src>
import jax
import jax.numpy as jnp
from jax.experimental import pallas as pl
from jax.experimental.pallas import tpu as pltpu

DWF = 8          # matches `dwf = 8` in the reference script
BN_EPS = 1e-5
LANE = 128       # output channels padded to a multiple of this (lane-dense stores)
TM_MAX = 1024    # row-tile cap (keeps double-buffered tiles well under VMEM limits)


def _round_up(x, m):
    return (x + m - 1) // m * m


# ----------------------------------------------------------------------------
# Fused matmul + ReLU + BN-affine + sigmoid Pallas kernel (the hot path)
# ----------------------------------------------------------------------------
def _make_fused_kernel(relu: bool, sigmoid: bool):
    def kernel(x_ref, w_ref, s_ref, t_ref, o_ref):
        y = jnp.dot(x_ref[...], w_ref[...], preferred_element_type=jnp.float32)
        if relu:
            y = jnp.maximum(y, 0.0)            # reference order: Conv -> ReLU -> BN
        y = y * s_ref[...] + t_ref[...]        # BN(eval) folded to affine (+ conv bias)
        if sigmoid:
            # exp + reciprocal both route to the EUP slot.
            y = pl.reciprocal(1.0 + jnp.exp(-y), approx=True)
        o_ref[...] = y.astype(o_ref.dtype)
    return kernel


def fused_matmul(x, w, scale, shift, *, relu=False, sigmoid=False,
                 out_dtype=jnp.bfloat16):
    """Y = act(affine(relu(x @ w))).  M-tiled grid, bf16 in, f32 accumulate."""
    M, K = x.shape
    K2, N = w.shape
    assert K == K2

    N_pad = _round_up(N, LANE)                 # lane-dense output slab
    TM = min(TM_MAX, _round_up(M, 16))         # multiple of 16 (bf16 sublane pack)
    M_pad = _round_up(M, TM)

    x = x.astype(jnp.bfloat16)
    w = w.astype(jnp.bfloat16)
    if M_pad != M:
        x = jnp.pad(x, ((0, M_pad - M), (0, 0)))
    if N_pad != N:
        w = jnp.pad(w, ((0, 0), (0, N_pad - N)))
        scale = jnp.pad(scale, (0, N_pad - N))
        shift = jnp.pad(shift, (0, N_pad - N))
    scale = scale.astype(jnp.float32).reshape(1, N_pad)
    shift = shift.astype(jnp.float32).reshape(1, N_pad)

    y = pl.pallas_call(
        _make_fused_kernel(relu, sigmoid),
        out_shape=jax.ShapeDtypeStruct((M_pad, N_pad), out_dtype),
        grid=(M_pad // TM,),
        in_specs=[
            pl.BlockSpec((TM, K), lambda i: (i, 0)),       # activation rows: tiled
            pl.BlockSpec((K, N_pad), lambda i: (0, 0)),    # weight: resident
            pl.BlockSpec((1, N_pad), lambda i: (0, 0)),    # scale: resident
            pl.BlockSpec((1, N_pad), lambda i: (0, 0)),    # shift: resident
        ],
        out_specs=pl.BlockSpec((TM, N_pad), lambda i: (i, 0)),
        compiler_params=pltpu.CompilerParams(
            dimension_semantics=("parallel",)),            # megacore on v7x
    )(x, w, scale, shift)
    return y[:M, :N]


# ----------------------------------------------------------------------------
# Glue: im2col, transpose-conv rearrangement, bilinear upsample, BN folding
# ----------------------------------------------------------------------------
def _im2col_3x3(x, stride):
    # x: (N, H, W, C) -> patches (N*Ho*Wo, 9*C), kernel-position-major columns.
    N, H, W, C = x.shape
    xp = jnp.pad(x, ((0, 0), (1, 1), (1, 1), (0, 0)))
    Ho = (H + 2 - 3) // stride + 1
    Wo = (W + 2 - 3) // stride + 1
    cols = []
    for ki in range(3):
        for kj in range(3):
            cols.append(xp[:, ki:ki + stride * (Ho - 1) + 1:stride,
                              kj:kj + stride * (Wo - 1) + 1:stride, :])
    patches = jnp.concatenate(cols, axis=-1)                # (N, Ho, Wo, 9*C)
    return patches.reshape(N * Ho * Wo, 9 * C), (N, Ho, Wo)


def _bn_to_affine(bn, cout):
    if bn is None:
        return jnp.ones((cout,), jnp.float32), jnp.zeros((cout,), jnp.float32)
    scale = bn["gamma"] / jnp.sqrt(bn["var"] + BN_EPS)
    shift = bn["beta"] - bn["mean"] * scale
    return scale, shift


def conv3x3(x, w, stride=1, bias=None, bn=None, relu=False, sigmoid=False,
            out_dtype=jnp.bfloat16):
    # w: (3, 3, Cin, Cout)
    assert bias is None or not relu            # bias only appears on no-ReLU layers
    Cout = w.shape[-1]
    patches, (N, Ho, Wo) = _im2col_3x3(x.astype(jnp.bfloat16), stride)
    w2d = w.reshape(9 * w.shape[2], Cout)
    scale, shift = _bn_to_affine(bn, Cout)
    if bias is not None:
        shift = shift + scale * bias           # fold conv bias into the affine shift
    y = fused_matmul(patches, w2d, scale, shift,
                     relu=relu, sigmoid=sigmoid, out_dtype=out_dtype)
    return y.reshape(N, Ho, Wo, Cout)


def convT2x2(x, w, bn=None, relu=True, out_dtype=jnp.bfloat16):
    # ConvTranspose2d(k=2, s=2, bias=False): w: (Cin, 2, 2, Cout)
    N, H, W, Cin = x.shape
    Cout = w.shape[-1]
    w2d = w.reshape(Cin, 4 * Cout)
    scale, shift = _bn_to_affine(bn, Cout)
    scale4 = jnp.tile(scale, 4)                # per-channel ops commute with the
    shift4 = jnp.tile(shift, 4)                # pixel interleave below
    y = fused_matmul(x.reshape(N * H * W, Cin).astype(jnp.bfloat16), w2d,
                     scale4, shift4, relu=relu, out_dtype=out_dtype)
    # TODO(synk): interleave/concat still go through XLA transpose + copy.
    y = y.reshape(N, H, W, 2, 2, Cout).transpose(0, 1, 3, 2, 4, 5)
    return y.reshape(N, 2 * H, 2 * W, Cout)


def upsample_bilinear_align_corners(x, factor):
    # Matches nn.Upsample(mode='bilinear', align_corners=True).
    N, H, W, C = x.shape
    Ho, Wo = H * factor, W * factor

    def interp_matrix(out_size, in_size):
        if in_size == 1:
            return jnp.ones((out_size, 1), jnp.float32)
        if out_size == 1:
            return jnp.zeros((1, in_size), jnp.float32).at[0, 0].set(1.0)
        src = jnp.arange(out_size, dtype=jnp.float32) * (in_size - 1) / (out_size - 1)
        i0 = jnp.clip(jnp.floor(src).astype(jnp.int32), 0, in_size - 2)
        wgt = src - i0.astype(jnp.float32)
        A = jnp.zeros((out_size, in_size), jnp.float32)
        A = A.at[jnp.arange(out_size), i0].add(1.0 - wgt)
        A = A.at[jnp.arange(out_size), i0 + 1].add(wgt)
        return A

    Ah = interp_matrix(Ho, H)
    Aw = interp_matrix(Wo, W)
    return jnp.einsum("ph,nhwc,qw->npqc", Ah, x.astype(jnp.float32), Aw)


# ----------------------------------------------------------------------------
# Deterministic parameter init (only modules used by forward())
# ----------------------------------------------------------------------------
def init_params(key, dwf=DWF):
    keys = iter(jax.random.split(key, 64))

    def w_conv(cin, cout):
        return 0.05 * jax.random.normal(next(keys), (3, 3, cin, cout), jnp.float32)

    def w_convT(cin, cout):
        return 0.05 * jax.random.normal(next(keys), (cin, 2, 2, cout), jnp.float32)

    def bn(c):
        return dict(
            gamma=1.0 + 0.1 * jax.random.normal(next(keys), (c,), jnp.float32),
            beta=0.1 * jax.random.normal(next(keys), (c,), jnp.float32),
            mean=0.1 * jax.random.normal(next(keys), (c,), jnp.float32),
            var=jnp.abs(jax.random.normal(next(keys), (c,), jnp.float32)) + 0.5,
        )

    p = {}
    p["inp_w"] = w_conv(4, 4)                                   # Conv2d(4,4), no bias
    p["e0"] = dict(w=w_conv(4, dwf * 2), bn=bn(dwf * 2))        # encode_same
    p["e1"] = dict(w=w_conv(dwf * 2, dwf * 4), bn=bn(dwf * 4))  # encode_half
    p["e2"] = dict(w=w_conv(dwf * 4, dwf * 8), bn=bn(dwf * 8))
    p["e3"] = dict(w=w_conv(dwf * 8, dwf * 16), bn=bn(dwf * 16))
    p["g3"] = dict(w=w_conv(dwf * 16, dwf * 16), bn=bn(dwf * 16))  # shared 3x in fwd
    p["f2"] = dict(w=w_convT(dwf * 16, dwf * 8), bn=bn(dwf * 8))           # drop=False
    p["f1"] = dict(w=w_convT(dwf * 8 + dwf * 8, dwf * 4), bn=bn(dwf * 4))  # drop=False
    p["f0"] = dict(w=w_convT(dwf * 4 + dwf * 4, 3), bn=bn(3))              # drop=False
    p["op2"] = dict(w=w_conv(dwf * 2 + 3, 3),
                    b=0.05 * jax.random.normal(next(keys), (3,), jnp.float32))
    # NOTE: h1..h5, dense1..3, op1, g0..g2, flat are defined in __init__ but never
    # used in forward(); they are intentionally not instantiated.
    return p


# ----------------------------------------------------------------------------
# DeepVO.forward
# ----------------------------------------------------------------------------
def deepvo_forward(params, x, mask, up_factor):
    z = upsample_bilinear_align_corners(mask, up_factor)        # self.up(mask)
    x = jnp.concatenate([x.astype(jnp.float32), z], axis=-1)    # cat((x, z), 1)
    x = conv3x3(x, params["inp_w"], stride=1)                   # self.inp
    e0 = conv3x3(x, params["e0"]["w"], 1, bn=params["e0"]["bn"], relu=True)
    e1 = conv3x3(e0, params["e1"]["w"], 2, bn=params["e1"]["bn"], relu=True)
    e2 = conv3x3(e1, params["e2"]["w"], 2, bn=params["e2"]["bn"], relu=True)
    e3 = conv3x3(e2, params["e3"]["w"], 2, bn=params["e3"]["bn"], relu=True)
    x = conv3x3(e3, params["g3"]["w"], 1, bn=params["g3"]["bn"], relu=True)
    x = conv3x3(x, params["g3"]["w"], 1, bn=params["g3"]["bn"], relu=True)
    x = conv3x3(x, params["g3"]["w"], 1, bn=params["g3"]["bn"], relu=True)
    x = convT2x2(x, params["f2"]["w"], bn=params["f2"]["bn"], relu=True)
    x = jnp.concatenate([e2, x], axis=-1)
    x = convT2x2(x, params["f1"]["w"], bn=params["f1"]["bn"], relu=True)
    x = jnp.concatenate([e1, x], axis=-1)
    x = convT2x2(x, params["f0"]["w"], bn=params["f0"]["bn"], relu=True)
    x = jnp.concatenate([e0, x], axis=-1)
    x = conv3x3(x, params["op2"]["w"], 1, bias=params["op2"]["b"],
                sigmoid=True, out_dtype=jnp.float32)
    return x                                                    # sigmoid(op2)


if __name__ == "__main__":
    key = jax.random.PRNGKey(0)
    kp, kx, km = jax.random.split(key, 3)
    params = init_params(kp, DWF)

    # thermal: 3 channels; mask: 1 channel at half resolution (img_row1/img_row = 2)
    x = jax.random.normal(kx, (2, 16, 16, 3), jnp.float32)      # NHWC
    mask = jax.random.uniform(km, (2, 8, 8, 1), jnp.float32)    # NHWC

    out = deepvo_forward(params, x, mask, up_factor=2)
    out = jax.block_until_ready(out)
    assert out.shape == (2, 16, 16, 3), out.shape
    assert bool(jnp.all(jnp.isfinite(out)))
    print("KERNEL_OK")
</pallas_src>

<mosaic_0001>
module attributes {stable_mosaic.version = 11 : i64} {
  func.func @kernel(%arg0: i32, %arg1: memref<512x36xbf16, #tpu.memory_space<vmem>>, %arg2: memref<36x128xbf16, #tpu.memory_space<vmem>>, %arg3: memref<1x128xf32, #tpu.memory_space<vmem>>, %arg4: memref<1x128xf32, #tpu.memory_space<vmem>>, %arg5: memref<512x128xbf16, #tpu.memory_space<vmem>>) attributes {dimension_semantics = [#tpu.dimension_semantics<parallel>], iteration_bounds = array<i64: 1>, scalar_prefetch = 0 : i64, scratch_operands = 0 : i64, tpu.core_type = #tpu.core_type<tc>, window_params = [{transform_indices = @transform_0, window_bounds = array<i64: 512, 36>}, {pipeline_mode = #tpu.pipeline_mode<synchronous>, transform_indices = @transform_1, window_bounds = array<i64: 36, 128>}, {pipeline_mode = #tpu.pipeline_mode<synchronous>, transform_indices = @transform_2, window_bounds = array<i64: 1, 128>}, {pipeline_mode = #tpu.pipeline_mode<synchronous>, transform_indices = @transform_3, window_bounds = array<i64: 1, 128>}, {transform_indices = @transform_4, window_bounds = array<i64: 512, 128>}]} {
    %c0 = arith.constant 0 : index
    %c0_0 = arith.constant 0 : index
    %0 = vector.load %arg1[%c0, %c0_0] : memref<512x36xbf16, #tpu.memory_space<vmem>>, vector<512x36xbf16>
    %c0_1 = arith.constant 0 : index
    %c0_2 = arith.constant 0 : index
    %1 = vector.load %arg2[%c0_1, %c0_2] : memref<36x128xbf16, #tpu.memory_space<vmem>>, vector<36x128xbf16>
    %cst = arith.constant dense<0.000000e+00> : vector<512x128xf32>
    %2 = tpu.matmul %0, %1, %cst {dimension_numbers = #tpu.dot_dimension_numbers<[1], [0], [0], [1], [0, 0, 1, 1], [], []>} : vector<512x36xbf16>, vector<36x128xbf16>, vector<512x128xf32> -> vector<512x128xf32>
    %c0_3 = arith.constant 0 : index
    %c0_4 = arith.constant 0 : index
    %3 = vector.load %arg3[%c0_3, %c0_4] : memref<1x128xf32, #tpu.memory_space<vmem>>, vector<1x128xf32>
    %4 = vector.broadcast %3 : vector<1x128xf32> to vector<512x128xf32>
    %5 = arith.mulf %2, %4 : vector<512x128xf32>
    %c0_5 = arith.constant 0 : index
    %c0_6 = arith.constant 0 : index
    %6 = vector.load %arg4[%c0_5, %c0_6] : memref<1x128xf32, #tpu.memory_space<vmem>>, vector<1x128xf32>
    %7 = vector.broadcast %6 : vector<1x128xf32> to vector<512x128xf32>
    %8 = arith.addf %5, %7 : vector<512x128xf32>
    %9 = arith.truncf %8 : vector<512x128xf32> to vector<512x128xbf16>
    %c0_7 = arith.constant 0 : index
    %c0_8 = arith.constant 0 : index
    %10 = vector.load %arg5[%c0_7, %c0_8] : memref<512x128xbf16, #tpu.memory_space<vmem>>, vector<512x128xbf16>
    tpu.vector_store %arg5[%c0_7, %c0_8], %9 {strides = array<i32>} : memref<512x128xbf16, #tpu.memory_space<vmem>>, vector<512x128xbf16>,
    return
  }
  func.func @transform_0(%arg0: i32) -> (i32, i32) {
    %c0_i32 = arith.constant 0 : i32
    %c0_i32_0 = arith.constant 0 : i32
    return %arg0, %c0_i32 : i32, i32
  }
  func.func @transform_1(%arg0: i32) -> (i32, i32) {
    %c0_i32 = arith.constant 0 : i32
    %c0_i32_0 = arith.constant 0 : i32
    %c0_i32_1 = arith.constant 0 : i32
    return %c0_i32, %c0_i32_0 : i32, i32
  }
  func.func @transform_2(%arg0: i32) -> (i32, i32) {
    %c0_i32 = arith.constant 0 : i32
    %c0_i32_0 = arith.constant 0 : i32
    %c0_i32_1 = arith.constant 0 : i32
    return %c0_i32, %c0_i32_0 : i32, i32
  }
  func.func @transform_3(%arg0: i32) -> (i32, i32) {
    %c0_i32 = arith.constant 0 : i32
    %c0_i32_0 = arith.constant 0 : i32
    %c0_i32_1 = arith.constant 0 : i32
    return %c0_i32, %c0_i32_0 : i32, i32
  }
  func.func @transform_4(%arg0: i32) -> (i32, i32) {
    %c0_i32 = arith.constant 0 : i32
    %c0_i32_0 = arith.constant 0 : i32
    return %arg0, %c0_i32 : i32, i32
  }
}

</mosaic_0001>

<bundles_post_ra>
// kernel: tpu_custom_call.1
= control target key start
LH: loop header
LB: loop body
LE: loop exit
PB: predicated region body
PF: predicated region fallthrough
CT: control target
= control target key end

     0   :  { %vm263_vm0 = vcmask 293888   ;;  %vm360_vm1 = vcmask 1041408   ;;  %s2009_s0 = inlined_call_operand.vmem [shape: bf16[512,36], index: 0, kind: input, shape index: {}]   ;;  %s2010_s1 = inlined_call_operand.vmem [shape: bf16[36,128], index: 1, kind: input, shape index: {}]   ;;  %s2011_s2 = inlined_call_operand.vmem [shape: f32[1,128], index: 2, kind: input, shape index: {}]   ;;  %s2012_s3 = inlined_call_operand.vmem [shape: f32[1,128], index: 3, kind: input, shape index: {}]   ;;  %s2013_s4 = inlined_call_operand.hbm [shape: bf16[512,128], index: 4, kind: output, shape index: {}]  }
   0x1   :  { %v1635_v0 = vld [vmem:[%s2010_s1] sm:$0xff]   ;;  %v1636_v1 = vld [vmem:[%s2010_s1 + $0x8] sm:$0xff]   ;;  %v1637_v2 = vld [vmem:[%s2010_s1 + $0x10] ss:$0 sps:$4 sm:$0x33]  }
   0x2   :  { %1554 = vmatprep.subr.bf16.mxu0 %v1635_v0  ;;  %1624 = vmatprep.subr.bf16.mxu1 %v1635_v0  ;;  %v1638_v3 = vld [vmem:[%s2009_s0] sm:$0xff]   ;;  %v362_v5 = vsel %vm360_vm1, %v1637_v2, 0  ;;  %v1640_v6 = vld [vmem:[%s2009_s0 + $0x8] sm:$0xff]   ;;  %v1642_v8 = vld [vmem:[%s2009_s0 + $0x10] sm:$0xff]  }
   0x3   :  { %1555 = vmatpush3.bf16.msra.mxu0 %v1635_v0  ;;  %1627 = vmatpush3.bf16.msra.mxu1 %v1635_v0  ;;  %v1639_v4 = vld [vmem:[%s2009_s0 + $0x80] sm:$0xff]   ;;  %v1641_v7 = vld [vmem:[%s2009_s0 + $0x88] sm:$0xff]   ;;  %v1643_v9 = vld [vmem:[%s2009_s0 + $0x90] sm:$0xff]  }
   0x4   :  { %1556 = vmatprep.subr.bf16.mxu0 %v1636_v1  ;;  %1625 = vmatprep.subr.bf16.mxu1 %v1636_v1  ;;  %v1644_v10 = vld [vmem:[%s2009_s0 + $0x18] sm:$0xff]   ;;  %v1646_v12 = vld [vmem:[%s2009_s0 + $0x20] sm:$0xff]   ;;  %v1648_v14 = vld [vmem:[%s2009_s0 + $0x28] sm:$0xff]  }
   0x5   :  { %1560 = vmatprep.mubr.msk.bf16.mxu0 %vm263_vm0, %v1638_v3  ;;  %1592 = vmatprep.mubr.msk.bf16.mxu1 %vm263_vm0, %v1639_v4  ;;  %v1645_v11 = vld [vmem:[%s2009_s0 + $0x98] sm:$0xff]   ;;  %v1647_v13 = vld [vmem:[%s2009_s0 + $0xa0] sm:$0xff]   ;;  %v1649_v15 = vld [vmem:[%s2009_s0 + $0xa8] sm:$0xff]  }
   0x6   :  { %v1650_v16 = vld [vmem:[%s2009_s0 + $0x30] sm:$0xff]   ;;  %v1652_v18 = vld [vmem:[%s2009_s0 + $0x38] sm:$0xff]  }
   0x7   :  { %1557 = vmatpush3.bf16.msra.mxu0 %v1636_v1  ;;  %1628 = vmatpush3.bf16.msra.mxu1 %v1636_v1  ;;  %v1651_v17 = vld [vmem:[%s2009_s0 + $0xb0] sm:$0xff]   ;;  %v1653_v19 = vld [vmem:[%s2009_s0 + $0xb8] sm:$0xff]  }
   0x8   :  { %1630 = vmatprep.subr.msk.bf16.mxu0 %vm360_vm1, %v1637_v2  ;;  %1631 = vmatprep.subr.msk.bf16.mxu1 %vm360_vm1, %v1637_v2 }
   0xb   :  { %1559 = vmatpush3.bf16.msra.mxu0 %v362_v5  ;;  %1629 = vmatpush3.bf16.msra.mxu1 %v362_v5 }
   0xe   :  { %1561 = vmatmul.mubr.msk.bf16.vlgmr.msra.gmra.mrb[0].mxu0 %vm263_vm0, %v1640_v6  ;;  %1593 = vmatmul.mubr.msk.bf16.vlgmr.msra.gmra.mrb[0].mxu1 %vm263_vm0, %v1641_v7 }
   0xf   :  { %1564 = vmatprep.mubr.msk.bf16.mxu0 %vm263_vm0, %v1642_v8  ;;  %1596 = vmatprep.mubr.msk.bf16.mxu1 %vm263_vm0, %v1643_v9 }
  0x16   :  { %1565 = vmatmul.mubr.msk.bf16.gmra.mrb[4].mxu0 %vm263_vm0, %v1644_v10  ;;  %1597 = vmatmul.mubr.msk.bf16.gmra.mrb[4].mxu1 %vm263_vm0, %v1645_v11 }
  0x17   :  { %1568 = vmatprep.mubr.msk.bf16.mxu0 %vm263_vm0, %v1646_v12  ;;  %1600 = vmatprep.mubr.msk.bf16.mxu1 %vm263_vm0, %v1647_v13 }
  0x1e   :  { %1569 = vmatmul.mubr.msk.bf16.gmra.mrb[8].mxu0 %vm263_vm0, %v1648_v14  ;;  %1601 = vmatmul.mubr.msk.bf16.gmra.mrb[8].mxu1 %vm263_vm0, %v1649_v15 }
  0x1f   :  { %1572 = vmatprep.mubr.msk.bf16.mxu0 %vm263_vm0, %v1650_v16  ;;  %1604 = vmatprep.mubr.msk.bf16.mxu1 %vm263_vm0, %v1651_v17 }
  0x20   :  { %9 = vsyncpa [#allocation3], 0  ;;  %v1654_v20 = vld [vmem:[%s2009_s0 + $0x40] sm:$0xff]   ;;  %v1656_v22 = vld [vmem:[%s2009_s0 + $0x48] sm:$0xff]  }
  0x21   :  { %v1655_v21 = vld [vmem:[%s2009_s0 + $0xc0] sm:$0xff]   ;;  %v1657_v23 = vld [vmem:[%s2009_s0 + $0xc8] sm:$0xff]   ;;  %v1658_v24 = vld [vmem:[%s2009_s0 + $0x50] sm:$0xff]  }
  0x22   :  { %v1659_v25 = vld [vmem:[%s2009_s0 + $0xd0] sm:$0xff]   ;;  %v1660_v26 = vld [vmem:[%s2009_s0 + $0x58] sm:$0xff]   ;;  %v1662_v28 = vld [vmem:[%s2009_s0 + $0x60] sm:$0xff]  }
  0x23   :  { %v1661_v27 = vld [vmem:[%s2009_s0 + $0xd8] sm:$0xff]   ;;  %v1663_v29 = vld [vmem:[%s2009_s0 + $0xe0] sm:$0xff]   ;;  %v1664_v30 = vld [vmem:[%s2009_s0 + $0x68] sm:$0xff]  }
  0x24   :  { %v1665_v31 = vld [vmem:[%s2009_s0 + $0xe8] sm:$0xff]   ;;  %v1666_v32 = vld [vmem:[%s2009_s0 + $0x70] sm:$0xff]   ;;  %v1668_v34 = vld [vmem:[%s2009_s0 + $0x78] sm:$0xff]  }
  0x25   :  { %v1667_v33 = vld [vmem:[%s2009_s0 + $0xf0] sm:$0xff]   ;;  %v1669_v35 = vld [vmem:[%s2009_s0 + $0xf8] sm:$0xff]   ;;  %v1862_v36 = vld [vmem:[%s2011_s2] ss:$0 sm:$0xff]  ;;  %s1694_s0 = smov [#allocation2]  }
  0x26   :  { %1573 = vmatmul.mubr.msk.bf16.gmra.mrb[12].mxu0 %vm263_vm0, %v1652_v18  ;;  %1605 = vmatmul.mubr.msk.bf16.gmra.mrb[12].mxu1 %vm263_vm0, %v1653_v19  ;;  %v1869_v43 = vld [vmem:[%s2012_s3] ss:$0 sm:$0xff]  ;;  %s1120_s2 = sshll.u32 %s1694_s0, 4  ;;  %s1121_s2 = int_to_ptr.vmem [resolvable:$true] %s1120_s2 }
  0x27   :  { %1576 = vmatprep.mubr.msk.bf16.mxu0 %vm263_vm0, %v1654_v20  ;;  %1608 = vmatprep.mubr.msk.bf16.mxu1 %vm263_vm0, %v1655_v21  ;;  %s1670_s3 = scalar_lea.vmem %s1121_s2, 4096  ;;  %p1675_p1 = scmp.lt.s32.totalorder %s1121_s2, %s1121_s2 }
  0x28   :  { %p1671_p0 = scmp.ne.s32.totalorder %s1121_s2, %s1670_s3  ;;  %p1676_p2 = scmp.lt.s32.totalorder %s1670_s3, %s1670_s3 }
  0x2a   :  { %p1677_p3 = por %p1676_p2, %p1675_p1 }
  0x2c   :  { %p1678_p4 = pnand %p1677_p3, %p1671_p0 }
  0x2e   :  { %1577 = vmatmul.mubr.msk.bf16.gmra.mrb[16].mxu0 %vm263_vm0, %v1656_v22  ;;  %1609 = vmatmul.mubr.msk.bf16.gmra.mrb[16].mxu1 %vm263_vm0, %v1657_v23 }
  0x2f   :  { %1580 = vmatprep.mubr.msk.bf16.mxu0 %vm263_vm0, %v1658_v24  ;;  %1612 = vmatprep.mubr.msk.bf16.mxu1 %vm263_vm0, %v1659_v25 }
  0x36   :  { %1581 = vmatmul.mubr.msk.bf16.gmra.mrb[20].mxu0 %vm263_vm0, %v1660_v26  ;;  %1613 = vmatmul.mubr.msk.bf16.gmra.mrb[20].mxu1 %vm263_vm0, %v1661_v27 }
  0x37   :  { %1584 = vmatprep.mubr.msk.bf16.mxu0 %vm263_vm0, %v1662_v28  ;;  %1616 = vmatprep.mubr.msk.bf16.mxu1 %vm263_vm0, %v1663_v29 }
  0x3e   :  { %1585 = vmatmul.mubr.msk.bf16.gmra.mrb[24].mxu0 %vm263_vm0, %v1664_v30  ;;  %1617 = vmatmul.mubr.msk.bf16.gmra.mrb[24].mxu1 %vm263_vm0, %v1665_v31 }
  0x3f   :  { %1588 = vmatprep.mubr.msk.bf16.mxu0 %vm263_vm0, %v1666_v32  ;;  %1620 = vmatprep.mubr.msk.bf16.mxu1 %vm263_vm0, %v1667_v33 }
  0x46   :  { %1589 = vmatmul.mubr.msk.bf16.gmra.mrb[28].mxu0 %vm263_vm0, %v1668_v34  ;;  %1621 = vmatmul.mubr.msk.bf16.gmra.mrb[28].mxu1 %vm263_vm0, %v1669_v35 }
  0xe1   :  { %v1562_v37 = vpop.f32.mrb[0].mxu0  ;;  %v1594_v38 = vpop.f32.mrb[0].mxu1 }
  0xe2   :  { %v662_v39 = vmul.f32 %v1562_v37, %v1862_v36  ;;  %v694_v40 = vmul.f32 %v1594_v38, %v1862_v36  ;;  %v398_v41 = vpop.f32.mrb[1].mxu0  ;;  %v526_v42 = vpop.f32.mrb[1].mxu1 }
  0xe3   :  { %v660_v44 = vmul.f32 %v1862_v36, %v398_v41  ;;  %v692_v45 = vmul.f32 %v1862_v36, %v526_v42  ;;  %v1563_v46 = vpop.f32.mrb[2].mxu0  ;;  %v1595_v47 = vpop.f32.mrb[2].mxu1 }
  0xe4   :  { %v663_v48 = vmul.f32 %v1563_v46, %v1862_v36  ;;  %v695_v49 = vmul.f32 %v1595_v47, %v1862_v36  ;;  %v401_v50 = vpop.f32.mrb[3].mxu0  ;;  %v529_v51 = vpop.f32.mrb[3].mxu1  ;;  %v733_v54 = vadd.f32 %v1869_v43, %v662_v39  ;;  %v765_v55 = vadd.f32 %v1869_v43, %v694_v40 }
  0xe5   :  { %v661_v52 = vmul.f32 %v1862_v36, %v401_v50  ;;  %v693_v53 = vmul.f32 %v1862_v36, %v529_v51  ;;  %v731_v58 = vadd.f32 %v1869_v43, %v660_v44  ;;  %v763_v59 = vadd.f32 %v1869_v43, %v692_v45 }
  0xe6   :  { %v734_v56 = vadd.f32 %v1869_v43, %v663_v48  ;;  %v766_v57 = vadd.f32 %v1869_v43, %v695_v49 }
  0xe7   :  { %v732_v60 = vadd.f32 %v1869_v43, %v661_v52  ;;  %v764_v61 = vadd.f32 %v1869_v43, %v693_v53 }
  0xe8   :  { %v1336_v62 = vpack.c.bf16 %v734_v56, %v733_v54  ;;  %v1416_v63 = vpack.c.bf16 %v766_v57, %v765_v55 }
  0xe9   :  { %v1331_v0 = vpack.c.bf16 %v732_v60, %v731_v58  ;;  %v1411_v1 = vpack.c.bf16 %v764_v61, %v763_v59  ;;  %v1566_v2 = vpop.f32.mrb[4].mxu0  ;;  %v1598_v3 = vpop.f32.mrb[4].mxu1 }
  0xea   :  { %1488 = vst [vmem:[#allocation2 + $0x8] sm:$0xff] %v1336_v62   ;;  %1504 = vst [vmem:[#allocation2 + $0x88] sm:$0xff] %v1416_v63   ;;  %v666_v4 = vmul.f32 %v1566_v2, %v1862_v36  ;;  %v698_v5 = vmul.f32 %v1598_v3, %v1862_v36  ;;  %v414_v6 = vpop.f32.mrb[5].mxu0  ;;  %v542_v7 = vpop.f32.mrb[5].mxu1 }
  0xeb   :  { %1332 = vst [vmem:[#allocation2] sm:$0xff] %v1331_v0   ;;  %1503 = vst [vmem:[#allocation2 + $0x80] sm:$0xff] %v1411_v1   ;;  %v664_v8 = vmul.f32 %v1862_v36, %v414_v6  ;;  %v696_v9 = vmul.f32 %v1862_v36, %v542_v7  ;;  %v1567_v10 = vpop.f32.mrb[6].mxu0  ;;  %v1599_v11 = vpop.f32.mrb[6].mxu1 }
  0xec   :  { %v667_v12 = vmul.f32 %v1567_v10, %v1862_v36  ;;  %v699_v13 = vmul.f32 %v1599_v11, %v1862_v36  ;;  %v417_v14 = vpop.f32.mrb[7].mxu0  ;;  %v545_v15 = vpop.f32.mrb[7].mxu1  ;;  %v737_v18 = vadd.f32 %v1869_v43, %v666_v4  ;;  %v769_v19 = vadd.f32 %v1869_v43, %v698_v5 }
  0xed   :  { %v665_v16 = vmul.f32 %v1862_v36, %v417_v14  ;;  %v697_v17 = vmul.f32 %v1862_v36, %v545_v15  ;;  %v735_v22 = vadd.f32 %v1869_v43, %v664_v8  ;;  %v767_v23 = vadd.f32 %v1869_v43, %v696_v9 }
  0xee   :  { %v738_v20 = vadd.f32 %v1869_v43, %v667_v12  ;;  %v770_v21 = vadd.f32 %v1869_v43, %v699_v13 }
  0xef   :  { %v736_v24 = vadd.f32 %v1869_v43, %v665_v16  ;;  %v768_v25 = vadd.f32 %v1869_v43, %v697_v17 }
  0xf0   :  { %v1346_v26 = vpack.c.bf16 %v738_v20, %v737_v18  ;;  %v1426_v27 = vpack.c.bf16 %v770_v21, %v769_v19 }
  0xf1   :  { %v1341_v28 = vpack.c.bf16 %v736_v24, %v735_v22  ;;  %v1421_v29 = vpack.c.bf16 %v768_v25, %v767_v23  ;;  %v1570_v30 = vpop.f32.mrb[8].mxu0  ;;  %v1602_v31 = vpop.f32.mrb[8].mxu1 }
  0xf2   :  { %1490 = vst [vmem:[#allocation2 + $0x18] sm:$0xff] %v1346_v26   ;;  %1506 = vst [vmem:[#allocation2 + $0x98] sm:$0xff] %v1426_v27   ;;  %v670_v32 = vmul.f32 %v1570_v30, %v1862_v36  ;;  %v702_v33 = vmul.f32 %v1602_v31, %v1862_v36  ;;  %v430_v34 = vpop.f32.mrb[9].mxu0  ;;  %v558_v35 = vpop.f32.mrb[9].mxu1 }
  0xf3   :  { %1489 = vst [vmem:[#allocation2 + $0x10] sm:$0xff] %v1341_v28   ;;  %1505 = vst [vmem:[#allocation2 + $0x90] sm:$0xff] %v1421_v29   ;;  %v668_v37 = vmul.f32 %v1862_v36, %v430_v34  ;;  %v700_v38 = vmul.f32 %v1862_v36, %v558_v35  ;;  %v1571_v39 = vpop.f32.mrb[10].mxu0  ;;  %v1603_v40 = vpop.f32.mrb[10].mxu1 }
  0xf4   :  { %v671_v41 = vmul.f32 %v1571_v39, %v1862_v36  ;;  %v703_v42 = vmul.f32 %v1603_v40, %v1862_v36  ;;  %v433_v44 = vpop.f32.mrb[11].mxu0  ;;  %v561_v45 = vpop.f32.mrb[11].mxu1  ;;  %v741_v48 = vadd.f32 %v1869_v43, %v670_v32  ;;  %v773_v49 = vadd.f32 %v1869_v43, %v702_v33 }
  0xf5   :  { %v669_v46 = vmul.f32 %v1862_v36, %v433_v44  ;;  %v701_v47 = vmul.f32 %v1862_v36, %v561_v45  ;;  %v739_v52 = vadd.f32 %v1869_v43, %v668_v37  ;;  %v771_v53 = vadd.f32 %v1869_v43, %v700_v38 }
  0xf6   :  { %v742_v50 = vadd.f32 %v1869_v43, %v671_v41  ;;  %v774_v51 = vadd.f32 %v1869_v43, %v703_v42 }
  0xf7   :  { %v740_v54 = vadd.f32 %v1869_v43, %v669_v46  ;;  %v772_v55 = vadd.f32 %v1869_v43, %v701_v47 }
  0xf8   :  { %v1356_v56 = vpack.c.bf16 %v742_v50, %v741_v48  ;;  %v1436_v57 = vpack.c.bf16 %v774_v51, %v773_v49 }
  0xf9   :  { %v1351_v58 = vpack.c.bf16 %v740_v54, %v739_v52  ;;  %v1431_v59 = vpack.c.bf16 %v772_v55, %v771_v53  ;;  %v1574_v60 = vpop.f32.mrb[12].mxu0  ;;  %v1606_v61 = vpop.f32.mrb[12].mxu1 }
  0xfa   :  { %1492 = vst [vmem:[#allocation2 + $0x28] sm:$0xff] %v1356_v56   ;;  %1508 = vst [vmem:[#allocation2 + $0xa8] sm:$0xff] %v1436_v57   ;;  %v674_v62 = vmul.f32 %v1574_v60, %v1862_v36  ;;  %v706_v63 = vmul.f32 %v1606_v61, %v1862_v36  ;;  %v446_v0 = vpop.f32.mrb[13].mxu0  ;;  %v574_v1 = vpop.f32.mrb[13].mxu1 }
  0xfb   :  { %1491 = vst [vmem:[#allocation2 + $0x20] sm:$0xff] %v1351_v58   ;;  %1507 = vst [vmem:[#allocation2 + $0xa0] sm:$0xff] %v1431_v59   ;;  %v672_v2 = vmul.f32 %v1862_v36, %v446_v0  ;;  %v704_v3 = vmul.f32 %v1862_v36, %v574_v1  ;;  %v1575_v4 = vpop.f32.mrb[14].mxu0  ;;  %v1607_v5 = vpop.f32.mrb[14].mxu1 }
  0xfc   :  { %v675_v6 = vmul.f32 %v1575_v4, %v1862_v36  ;;  %v707_v7 = vmul.f32 %v1607_v5, %v1862_v36  ;;  %v449_v8 = vpop.f32.mrb[15].mxu0  ;;  %v577_v9 = vpop.f32.mrb[15].mxu1  ;;  %v745_v12 = vadd.f32 %v1869_v43, %v674_v62  ;;  %v777_v13 = vadd.f32 %v1869_v43, %v706_v63 }
  0xfd   :  { %v673_v10 = vmul.f32 %v1862_v36, %v449_v8  ;;  %v705_v11 = vmul.f32 %v1862_v36, %v577_v9  ;;  %v743_v16 = vadd.f32 %v1869_v43, %v672_v2  ;;  %v775_v17 = vadd.f32 %v1869_v43, %v704_v3 }
  0xfe   :  { %v746_v14 = vadd.f32 %v1869_v43, %v675_v6  ;;  %v778_v15 = vadd.f32 %v1869_v43, %v707_v7 }
  0xff   :  { %v744_v18 = vadd.f32 %v1869_v43, %v673_v10  ;;  %v776_v19 = vadd.f32 %v1869_v43, %v705_v11 }
 0x100   :  { %v1366_v20 = vpack.c.bf16 %v746_v14, %v745_v12  ;;  %v1446_v21 = vpack.c.bf16 %v778_v15, %v777_v13 }
 0x101   :  { %v1361_v22 = vpack.c.bf16 %v744_v18, %v743_v16  ;;  %v1441_v23 = vpack.c.bf16 %v776_v19, %v775_v17  ;;  %v1578_v24 = vpop.f32.mrb[16].mxu0  ;;  %v1610_v25 = vpop.f32.mrb[16].mxu1 }
 0x102   :  { %1494 = vst [vmem:[#allocation2 + $0x38] sm:$0xff] %v1366_v20   ;;  %1510 = vst [vmem:[#allocation2 + $0xb8] sm:$0xff] %v1446_v21   ;;  %v678_v26 = vmul.f32 %v1578_v24, %v1862_v36  ;;  %v710_v27 = vmul.f32 %v1610_v25, %v1862_v36  ;;  %v462_v28 = vpop.f32.mrb[17].mxu0  ;;  %v590_v29 = vpop.f32.mrb[17].mxu1 }
 0x103   :  { %1493 = vst [vmem:[#allocation2 + $0x30] sm:$0xff] %v1361_v22   ;;  %1509 = vst [vmem:[#allocation2 + $0xb0] sm:$0xff] %v1441_v23   ;;  %v676_v30 = vmul.f32 %v1862_v36, %v462_v28  ;;  %v708_v31 = vmul.f32 %v1862_v36, %v590_v29  ;;  %v1579_v32 = vpop.f32.mrb[18].mxu0  ;;  %v1611_v33 = vpop.f32.mrb[18].mxu1 }
 0x104   :  { %v679_v34 = vmul.f32 %v1579_v32, %v1862_v36  ;;  %v711_v35 = vmul.f32 %v1611_v33, %v1862_v36  ;;  %v465_v37 = vpop.f32.mrb[19].mxu0  ;;  %v593_v38 = vpop.f32.mrb[19].mxu1  ;;  %v749_v41 = vadd.f32 %v1869_v43, %v678_v26  ;;  %v781_v42 = vadd.f32 %v1869_v43, %v710_v27 }
 0x105   :  { %v677_v39 = vmul.f32 %v1862_v36, %v465_v37  ;;  %v709_v40 = vmul.f32 %v1862_v36, %v593_v38  ;;  %v747_v46 = vadd.f32 %v1869_v43, %v676_v30  ;;  %v779_v47 = vadd.f32 %v1869_v43, %v708_v31 }
 0x106   :  { %v750_v44 = vadd.f32 %v1869_v43, %v679_v34  ;;  %v782_v45 = vadd.f32 %v1869_v43, %v711_v35 }
 0x107   :  { %v748_v48 = vadd.f32 %v1869_v43, %v677_v39  ;;  %v780_v49 = vadd.f32 %v1869_v43, %v709_v40 }
 0x108   :  { %v1376_v50 = vpack.c.bf16 %v750_v44, %v749_v41  ;;  %v1456_v51 = vpack.c.bf16 %v782_v45, %v781_v42 }
 0x109   :  { %v1371_v52 = vpack.c.bf16 %v748_v48, %v747_v46  ;;  %v1451_v53 = vpack.c.bf16 %v780_v49, %v779_v47  ;;  %v1582_v54 = vpop.f32.mrb[20].mxu0  ;;  %v1614_v55 = vpop.f32.mrb[20].mxu1 }
 0x10a   :  { %1496 = vst [vmem:[#allocation2 + $0x48] sm:$0xff] %v1376_v50   ;;  %1512 = vst [vmem:[#allocation2 + $0xc8] sm:$0xff] %v1456_v51   ;;  %v682_v56 = vmul.f32 %v1582_v54, %v1862_v36  ;;  %v714_v57 = vmul.f32 %v1614_v55, %v1862_v36  ;;  %v478_v58 = vpop.f32.mrb[21].mxu0  ;;  %v606_v59 = vpop.f32.mrb[21].mxu1 }
 0x10b   :  { %1495 = vst [vmem:[#allocation2 + $0x40] sm:$0xff] %v1371_v52   ;;  %1511 = vst [vmem:[#allocation2 + $0xc0] sm:$0xff] %v1451_v53   ;;  %v680_v60 = vmul.f32 %v1862_v36, %v478_v58  ;;  %v712_v61 = vmul.f32 %v1862_v36, %v606_v59  ;;  %v1583_v62 = vpop.f32.mrb[22].mxu0  ;;  %v1615_v63 = vpop.f32.mrb[22].mxu1 }
 0x10c   :  { %v683_v0 = vmul.f32 %v1583_v62, %v1862_v36  ;;  %v715_v1 = vmul.f32 %v1615_v63, %v1862_v36  ;;  %v481_v2 = vpop.f32.mrb[23].mxu0  ;;  %v609_v3 = vpop.f32.mrb[23].mxu1  ;;  %v753_v6 = vadd.f32 %v1869_v43, %v682_v56  ;;  %v785_v7 = vadd.f32 %v1869_v43, %v714_v57 }
 0x10d   :  { %v681_v4 = vmul.f32 %v1862_v36, %v481_v2  ;;  %v713_v5 = vmul.f32 %v1862_v36, %v609_v3  ;;  %v751_v10 = vadd.f32 %v1869_v43, %v680_v60  ;;  %v783_v11 = vadd.f32 %v1869_v43, %v712_v61 }
 0x10e   :  { %v754_v8 = vadd.f32 %v1869_v43, %v683_v0  ;;  %v786_v9 = vadd.f32 %v1869_v43, %v715_v1 }
 0x10f   :  { %v752_v12 = vadd.f32 %v1869_v43, %v681_v4  ;;  %v784_v13 = vadd.f32 %v1869_v43, %v713_v5 }
 0x110   :  { %v1386_v14 = vpack.c.bf16 %v754_v8, %v753_v6  ;;  %v1466_v15 = vpack.c.bf16 %v786_v9, %v785_v7 }
 0x111   :  { %v1381_v16 = vpack.c.bf16 %v752_v12, %v751_v10  ;;  %v1461_v17 = vpack.c.bf16 %v784_v13, %v783_v11  ;;  %v1586_v18 = vpop.f32.mrb[24].mxu0  ;;  %v1618_v19 = vpop.f32.mrb[24].mxu1 }
 0x112   :  { %1498 = vst [vmem:[#allocation2 + $0x58] sm:$0xff] %v1386_v14   ;;  %1514 = vst [vmem:[#allocation2 + $0xd8] sm:$0xff] %v1466_v15   ;;  %v686_v20 = vmul.f32 %v1586_v18, %v1862_v36  ;;  %v718_v21 = vmul.f32 %v1618_v19, %v1862_v36  ;;  %v494_v22 = vpop.f32.mrb[25].mxu0  ;;  %v622_v23 = vpop.f32.mrb[25].mxu1 }
 0x113   :  { %1497 = vst [vmem:[#allocation2 + $0x50] sm:$0xff] %v1381_v16   ;;  %1513 = vst [vmem:[#allocation2 + $0xd0] sm:$0xff] %v1461_v17   ;;  %v684_v24 = vmul.f32 %v1862_v36, %v494_v22  ;;  %v716_v25 = vmul.f32 %v1862_v36, %v622_v23  ;;  %v1587_v26 = vpop.f32.mrb[26].mxu0  ;;  %v1619_v27 = vpop.f32.mrb[26].mxu1 }
 0x114   :  { %v687_v28 = vmul.f32 %v1587_v26, %v1862_v36  ;;  %v719_v29 = vmul.f32 %v1619_v27, %v1862_v36  ;;  %v497_v30 = vpop.f32.mrb[27].mxu0  ;;  %v625_v31 = vpop.f32.mrb[27].mxu1  ;;  %v757_v34 = vadd.f32 %v1869_v43, %v686_v20  ;;  %v789_v35 = vadd.f32 %v1869_v43, %v718_v21 }
 0x115   :  { %v685_v32 = vmul.f32 %v1862_v36, %v497_v30  ;;  %v717_v33 = vmul.f32 %v1862_v36, %v625_v31  ;;  %v755_v39 = vadd.f32 %v1869_v43, %v684_v24  ;;  %v787_v40 = vadd.f32 %v1869_v43, %v716_v25 }
 0x116   :  { %v758_v37 = vadd.f32 %v1869_v43, %v687_v28  ;;  %v790_v38 = vadd.f32 %v1869_v43, %v719_v29 }
 0x117   :  { %v756_v41 = vadd.f32 %v1869_v43, %v685_v32  ;;  %v788_v42 = vadd.f32 %v1869_v43, %v717_v33 }
 0x118   :  { %v1396_v44 = vpack.c.bf16 %v758_v37, %v757_v34  ;;  %v1476_v45 = vpack.c.bf16 %v790_v38, %v789_v35 }
 0x119   :  { %v1391_v46 = vpack.c.bf16 %v756_v41, %v755_v39  ;;  %v1471_v47 = vpack.c.bf16 %v788_v42, %v787_v40  ;;  %v1590_v48 = vpop.f32.mrb[28].mxu0  ;;  %v1622_v49 = vpop.f32.mrb[28].mxu1 }
 0x11a   :  { %1500 = vst [vmem:[#allocation2 + $0x68] sm:$0xff] %v1396_v44   ;;  %1516 = vst [vmem:[#allocation2 + $0xe8] sm:$0xff] %v1476_v45   ;;  %v690_v50 = vmul.f32 %v1590_v48, %v1862_v36  ;;  %v722_v51 = vmul.f32 %v1622_v49, %v1862_v36  ;;  %v510_v52 = vpop.f32.mrb[29].mxu0  ;;  %v638_v53 = vpop.f32.mrb[29].mxu1 }
 0x11b   :  { %1499 = vst [vmem:[#allocation2 + $0x60] sm:$0xff] %v1391_v46   ;;  %1515 = vst [vmem:[#allocation2 + $0xe0] sm:$0xff] %v1471_v47   ;;  %v688_v54 = vmul.f32 %v1862_v36, %v510_v52  ;;  %v720_v55 = vmul.f32 %v1862_v36, %v638_v53  ;;  %v1591_v56 = vpop.f32.mrb[30].mxu0  ;;  %v1623_v57 = vpop.f32.mrb[30].mxu1 }
 0x11c   :  { %v691_v58 = vmul.f32 %v1591_v56, %v1862_v36  ;;  %v723_v59 = vmul.f32 %v1623_v57, %v1862_v36  ;;  %v513_v60 = vpop.f32.mrb[31].mxu0  ;;  %v641_v61 = vpop.f32.mrb[31].mxu1  ;;  %v761_v0 = vadd.f32 %v1869_v43, %v690_v50  ;;  %v793_v1 = vadd.f32 %v1869_v43, %v722_v51 }
 0x11d   :  { %v689_v62 = vmul.f32 %v1862_v36, %v513_v60  ;;  %v721_v63 = vmul.f32 %v1862_v36, %v641_v61  ;;  %v759_v4 = vadd.f32 %v1869_v43, %v688_v54  ;;  %v791_v5 = vadd.f32 %v1869_v43, %v720_v55 }
 0x11e   :  { %v762_v2 = vadd.f32 %v1869_v43, %v691_v58  ;;  %v794_v3 = vadd.f32 %v1869_v43, %v723_v59 }
 0x11f   :  { %v760_v6 = vadd.f32 %v1869_v43, %v689_v62  ;;  %v792_v7 = vadd.f32 %v1869_v43, %v721_v63 }
 0x120   :  { %v1406_v8 = vpack.c.bf16 %v762_v2, %v761_v0  ;;  %v1486_v36 = vpack.c.bf16 %v794_v3, %v793_v1 }
 0x121   :  { %v1401_v9 = vpack.c.bf16 %v760_v6, %v759_v4  ;;  %v1481_v10 = vpack.c.bf16 %v792_v7, %v791_v5 }
 0x122   :  { %1502 = vst [vmem:[#allocation2 + $0x78] sm:$0xff] %v1406_v8   ;;  %1518 = vst [vmem:[#allocation2 + $0xf8] sm:$0xff] %v1486_v36  }
 0x123   :  { %1501 = vst [vmem:[#allocation2 + $0x70] sm:$0xff] %v1401_v9   ;;  %1517 = vst [vmem:[#allocation2 + $0xf0] sm:$0xff] %v1481_v10  }
 0x124   :  { %1681 = shalt.err (!%p1678_p4)
}
 0x125   :  { %s1682_s10 = scalar_lea.hbm %s2013_s4, 4096 }
 0x126   :  { %p1683_p5 = scmp.ne.s32.totalorder %s2013_s4, %s1682_s10  ;;  %p1686_p6 = scmp.lt.u32.totalorder %s1682_s10, %s2013_s4 }
 0x128   :  { %p1688_p7 = pnand %p1686_p6, %p1683_p5 }
 0x12a   :  { %1691 = shalt.err (!%p1688_p7)
}
 0x12b   :  { %s1695_s15 = smov 64   ;;  %s1696_s16 = smov 4  }
 0x12c   :  { %1126 = dma.vmem_to_hbm [thread:$0]  %s1121_s2, 4096, %s2013_s4, [#allocation3], %s1695_s15, %s1695_s15, %s1696_s16  }
 0x12d   :  { %1692 = dma.done.wait [#allocation3], 4096  }
 0x12e   :  { %1693 = vsyncadd [#allocation3], 4294963200 }
 0x12f   :  { %1130 = vsyncpa [#allocation3], 1 }

</bundles_post_ra>
